<compile_context>
chip_gen: v7x
topology: tpu7x:2x2x1
jax: 0.10.0
libtpu: 0.0.40
codegen_flags: <defaults>
</compile_context>

<pallas_src>
import math

import jax
import jax.numpy as jnp
from jax import lax
from jax.experimental import pallas as pl
from jax.experimental.pallas import tpu as pltpu


def _attn_out_kernel(q_ref, k_ref, v_ref, wo_ref, bo_ref, out_ref, acc_ref):
    h = pl.program_id(2)

    q = q_ref[0, 0]            # (TQ, D) — 1/sqrt(D) already folded in
    k = k_ref[0, h]            # (T,  D) — resident per batch, sliced per head
    v = v_ref[0, h]            # (T,  D)

    # scores = q @ k^T — contract on k's last dim (no materialized transpose).
    scores = lax.dot_general(q, k, (((1,), (1,)), ((), ())),
                             preferred_element_type=jnp.float32)        # (TQ, T)

    attn = jnp.dot(scores.astype(v.dtype), v,
                   preferred_element_type=jnp.float32)                  # (TQ, D)

    # This head's contribution to the output projection.
    contrib = jnp.dot(attn.astype(v.dtype), wo_ref[h],
                      preferred_element_type=jnp.float32)               # (TQ, E)

    @pl.when(h == 0)
    def _():
        acc_ref[...] = contrib          # direct write: no zero-fill + add

    @pl.when(h != 0)
    def _():
        acc_ref[...] += contrib

    @pl.when(h == pl.num_programs(2) - 1)
    def _():
        out_ref[0] = (acc_ref[...] + bo_ref[...]).astype(out_ref.dtype)


def _choose_row_tile(T, sublane, max_tile=256):
    """Largest multiple-of-`sublane` divisor of T that is <= max_tile (else T)."""
    if T <= max_tile:
        return T
    start = max_tile - (max_tile % sublane)
    for tq in range(start, sublane - 1, -sublane):
        if T % tq == 0:
            return tq
    return T


def _vmem_budget(B, T, E, H, D, TQ, csize):
    est = (
        2 * TQ * D * csize            # Q block (double-buffered)
        + 2 * 2 * H * T * D * csize   # K, V resident blocks (double-buffered)
        + 2 * H * D * E * csize       # Wo slab
        + 2 * E * 4                   # bo
        + 2 * TQ * E * 4              # output block (double-buffered, f32)
        + TQ * E * 4                  # accumulator scratch
        + TQ * T * 4                  # live scores intermediate
        + (8 << 20)                   # headroom for vregs / pipeline
    )
    # Cap at 64 MiB so the same config is safe on v7x; floor at 32 MiB.
    return int(max(32 << 20, min(est, 64 << 20)))


def multi_head_attention(x, params, num_heads, *, row_tile=None,
                         compute_dtype=jnp.bfloat16):
    """x: (B, T, E) float32 -> (B, T, E) float32.

    Matches MultiHeadAttention.forward: no softmax, scale = 1/sqrt(head_dim),
    Linear weights stored pre-transposed as (in, out).
    compute_dtype controls matmul operand precision inside the attention kernel
    (accumulation is always f32); use jnp.float32 for strict parity testing.
    """
    B, T, E = x.shape
    H = num_heads
    assert E % H == 0, "embed_size must be divisible by num_heads"
    D = E // H

    wq, bq, wk, bk, wv, bv, wo, bo = params

    sublane = 16 if compute_dtype == jnp.bfloat16 else 8
    TQ = row_tile if row_tile is not None else _choose_row_tile(T, sublane)
    assert T % TQ == 0 and (TQ == T or TQ % sublane == 0)
    n_q = T // TQ
    # v7x megacore balance: prefer >= 2 parallel tiles when B == 1.
    if row_tile is None and B == 1 and n_q == 1 and T % (2 * sublane) == 0:
        TQ = T // 2
        n_q = 2

    inv_sqrt_d = 1.0 / math.sqrt(D)

    # Q/K/V projections as plain XLA matmuls (full-width MXU, weights read once).
    xf = x.astype(jnp.float32)
    q = (xf @ wq + bq) * inv_sqrt_d       # fold the attention scale into Q
    k = xf @ wk + bk
    v = xf @ wv + bv

    def split_heads(t):                   # (B, T, E) -> (B, H, T, D)
        return t.reshape(B, T, H, D).transpose(0, 2, 1, 3).astype(compute_dtype)

    q_h, k_h, v_h = split_heads(q), split_heads(k), split_heads(v)
    wo_h = wo.reshape(H, D, E).astype(compute_dtype)   # rows of head h
    bo_2 = bo.reshape(1, E).astype(jnp.float32)

    csize = jnp.dtype(compute_dtype).itemsize
    vmem_limit = _vmem_budget(B, T, E, H, D, TQ, csize)

    cost = pl.CostEstimate(
        flops=4 * B * H * T * T * D + 2 * B * T * E * E,
        transcendentals=0,
        bytes_accessed=(3 * B * T * E * csize      # Q, K, V reads
                        + H * D * E * csize        # Wo (read once, resident)
                        + E * 4                    # bo
                        + B * T * E * 4),          # output write
    )

    # TODO(synk): for very large T*E in f32 the resident (1,H,T,D) K/V blocks may
    # need an extra "arbitrary" KV-tile axis over T (plain running sum, no softmax).
    return pl.pallas_call(
        _attn_out_kernel,
        out_shape=jax.ShapeDtypeStruct((B, T, E), x.dtype),
        grid=(B, n_q, H),
        in_specs=[
            pl.BlockSpec((1, 1, TQ, D), lambda b, qi, h: (b, h, qi, 0)),   # Q tile
            pl.BlockSpec((1, H, T, D), lambda b, qi, h: (b, 0, 0, 0)),     # K (per-batch resident)
            pl.BlockSpec((1, H, T, D), lambda b, qi, h: (b, 0, 0, 0)),     # V (per-batch resident)
            pl.BlockSpec((H, D, E), lambda b, qi, h: (0, 0, 0)),           # Wo (resident slab)
            pl.BlockSpec((1, E), lambda b, qi, h: (0, 0)),                 # bo
        ],
        out_specs=pl.BlockSpec((1, TQ, E), lambda b, qi, h: (b, qi, 0)),   # lane-dense (full E)
        scratch_shapes=[pltpu.VMEM((TQ, E), jnp.float32)],
        compiler_params=pltpu.CompilerParams(
            dimension_semantics=("parallel", "parallel", "arbitrary"),
            vmem_limit_bytes=vmem_limit,
        ),
        cost_estimate=cost,
    )(q_h, k_h, v_h, wo_h, bo_2)


def init_params(key, embed_size):
    """Deterministic synthetic init. Linear weights stored as (in, out)."""
    keys = jax.random.split(key, 8)
    scale = 0.02

    def lin(kw, kb):
        w = scale * jax.random.normal(kw, (embed_size, embed_size), jnp.float32)
        b = scale * jax.random.normal(kb, (embed_size,), jnp.float32)
        return w, b

    wq, bq = lin(keys[0], keys[1])
    wk, bk = lin(keys[2], keys[3])
    wv, bv = lin(keys[4], keys[5])
    wo, bo = lin(keys[6], keys[7])
    return (wq, bq, wk, bk, wv, bv, wo, bo)


def _mha_reference(x, params, num_heads):
    """Pure-JAX reference mirroring the PyTorch forward."""
    wq, bq, wk, bk, wv, bv, wo, bo = params
    B, T, E = x.shape
    D = E // num_heads
    q = x @ wq + bq
    k = x @ wk + bk
    v = x @ wv + bv

    def split(t):
        return t.reshape(B, T, num_heads, D).transpose(0, 2, 1, 3)

    Q, K, V = split(q), split(k), split(v)
    s = jnp.einsum('bhqd,bhkd->bhqk', Q, K) / math.sqrt(D)
    a = jnp.einsum('bhqk,bhkd->bhqd', s, V)
    a = a.transpose(0, 2, 1, 3).reshape(B, T, E)
    return a @ wo + bo


if __name__ == "__main__":
    B, T, E, H = 2, 8, 32, 4
    key = jax.random.PRNGKey(0)
    k_x, k_p = jax.random.split(key)
    x = jax.random.normal(k_x, (B, T, E), jnp.float32)
    params = init_params(k_p, E)

    ref = _mha_reference(x, params, H)

    # Strict-parity path (f32 matmul operands).
    out_f32 = multi_head_attention(x, params, num_heads=H, compute_dtype=jnp.float32)
    jax.block_until_ready(out_f32)
    assert out_f32.shape == (B, T, E)
    assert float(jnp.max(jnp.abs(out_f32 - ref))) < 1e-3

    # Default fast path (bf16 matmul operands, f32 accumulation) — looser tolerance.
    out_bf16 = multi_head_attention(x, params, num_heads=H)
    jax.block_until_ready(out_bf16)
    err = float(jnp.max(jnp.abs(out_bf16 - ref)))
    tol = 2e-2 * (float(jnp.max(jnp.abs(ref))) + 1e-6) + 1e-3
    assert err < tol, (err, tol)

    print("KERNEL_OK")
</pallas_src>

<mosaic_0001>
module attributes {stable_mosaic.version = 11 : i64} {
  func.func @_attn_out_kernel(%arg0: i32, %arg1: i32, %arg2: i32, %arg3: memref<1x1x8x8xf32, #tpu.memory_space<vmem>>, %arg4: memref<1x4x8x8xf32, #tpu.memory_space<vmem>>, %arg5: memref<1x4x8x8xf32, #tpu.memory_space<vmem>>, %arg6: memref<4x8x32xf32, #tpu.memory_space<vmem>>, %arg7: memref<1x32xf32, #tpu.memory_space<vmem>>, %arg8: memref<1x8x32xf32, #tpu.memory_space<vmem>>, %arg9: memref<8x32xf32, #tpu.memory_space<vmem>>) attributes {dimension_semantics = [#tpu.dimension_semantics<parallel>, #tpu.dimension_semantics<parallel>, #tpu.dimension_semantics<arbitrary>], iteration_bounds = array<i64: 2, 1, 4>, scalar_prefetch = 0 : i64, scratch_operands = 1 : i64, tpu.core_type = #tpu.core_type<tc>, window_params = [{transform_indices = @transform_0, window_bounds = array<i64: 1, 1, 8, 8>}, {transform_indices = @transform_1, window_bounds = array<i64: 1, 4, 8, 8>}, {transform_indices = @transform_2, window_bounds = array<i64: 1, 4, 8, 8>}, {pipeline_mode = #tpu.pipeline_mode<synchronous>, transform_indices = @transform_3, window_bounds = array<i64: 4, 8, 32>}, {pipeline_mode = #tpu.pipeline_mode<synchronous>, transform_indices = @transform_4, window_bounds = array<i64: 1, 32>}, {transform_indices = @transform_5, window_bounds = array<i64: 1, 8, 32>}]} {
    %c0 = arith.constant 0 : index
    %c0_0 = arith.constant 0 : index
    %c0_1 = arith.constant 0 : index
    %c0_2 = arith.constant 0 : index
    %0 = vector.load %arg3[%c0, %c0_0, %c0_1, %c0_2] : memref<1x1x8x8xf32, #tpu.memory_space<vmem>>, vector<1x1x8x8xf32>
    %1 = vector.shape_cast %0 : vector<1x1x8x8xf32> to vector<8x8xf32>
    %c0_3 = arith.constant 0 : index
    %2 = arith.index_cast %arg2 : i32 to index
    %c0_4 = arith.constant 0 : index
    %c0_5 = arith.constant 0 : index
    %3 = vector.load %arg4[%c0_3, %2, %c0_4, %c0_5] : memref<1x4x8x8xf32, #tpu.memory_space<vmem>>, vector<1x1x8x8xf32>
    %4 = vector.shape_cast %3 : vector<1x1x8x8xf32> to vector<8x8xf32>
    %c0_6 = arith.constant 0 : index
    %5 = arith.index_cast %arg2 : i32 to index
    %c0_7 = arith.constant 0 : index
    %c0_8 = arith.constant 0 : index
    %6 = vector.load %arg5[%c0_6, %5, %c0_7, %c0_8] : memref<1x4x8x8xf32, #tpu.memory_space<vmem>>, vector<1x1x8x8xf32>
    %7 = vector.shape_cast %6 : vector<1x1x8x8xf32> to vector<8x8xf32>
    %cst = arith.constant dense<0.000000e+00> : vector<8x8xf32>
    %8 = tpu.matmul %1, %4, %cst {dimension_numbers = #tpu.dot_dimension_numbers<[1], [1], [0], [0], [0, 0, 1, 0], [], []>} : vector<8x8xf32>, vector<8x8xf32>, vector<8x8xf32> -> vector<8x8xf32>
    %cst_9 = arith.constant dense<0.000000e+00> : vector<8x8xf32>
    %9 = tpu.matmul %8, %7, %cst_9 {dimension_numbers = #tpu.dot_dimension_numbers<[1], [0], [0], [1], [0, 0, 1, 1], [], []>} : vector<8x8xf32>, vector<8x8xf32>, vector<8x8xf32> -> vector<8x8xf32>
    %10 = arith.index_cast %arg2 : i32 to index
    %c0_10 = arith.constant 0 : index
    %c0_11 = arith.constant 0 : index
    %11 = vector.load %arg6[%10, %c0_10, %c0_11] : memref<4x8x32xf32, #tpu.memory_space<vmem>>, vector<1x8x32xf32>
    %12 = vector.shape_cast %11 : vector<1x8x32xf32> to vector<8x32xf32>
    %cst_12 = arith.constant dense<0.000000e+00> : vector<8x32xf32>
    %13 = tpu.matmul %9, %12, %cst_12 {dimension_numbers = #tpu.dot_dimension_numbers<[1], [0], [0], [1], [0, 0, 1, 1], [], []>} : vector<8x8xf32>, vector<8x32xf32>, vector<8x32xf32> -> vector<8x32xf32>
    %c0_i32 = arith.constant 0 : i32
    %14 = arith.cmpi eq, %arg2, %c0_i32 : i32
    %15 = arith.extui %14 : i1 to i32
    %c0_i32_13 = arith.constant 0 : i32
    %16 = arith.cmpi ne, %15, %c0_i32_13 : i32
    scf.if %16 {
      %c0_17 = arith.constant 0 : index
      %c0_18 = arith.constant 0 : index
      %23 = vector.load %arg9[%c0_17, %c0_18] : memref<8x32xf32, #tpu.memory_space<vmem>>, vector<8x32xf32>
      tpu.vector_store %arg9[%c0_17, %c0_18], %13 {strides = array<i32>} : memref<8x32xf32, #tpu.memory_space<vmem>>, vector<8x32xf32>,
    } else {
    }
    %c0_i32_14 = arith.constant 0 : i32
    %17 = arith.cmpi ne, %arg2, %c0_i32_14 : i32
    %18 = arith.extui %17 : i1 to i32
    %c0_i32_15 = arith.constant 0 : i32
    %19 = arith.cmpi ne, %18, %c0_i32_15 : i32
    scf.if %19 {
      %c0_17 = arith.constant 0 : index
      %c0_18 = arith.constant 0 : index
      %23 = vector.load %arg9[%c0_17, %c0_18] : memref<8x32xf32, #tpu.memory_space<vmem>>, vector<8x32xf32>
      %24 = arith.addf %23, %13 : vector<8x32xf32>
      %c0_19 = arith.constant 0 : index
      %c0_20 = arith.constant 0 : index
      %25 = vector.load %arg9[%c0_19, %c0_20] : memref<8x32xf32, #tpu.memory_space<vmem>>, vector<8x32xf32>
      tpu.vector_store %arg9[%c0_19, %c0_20], %24 {strides = array<i32>} : memref<8x32xf32, #tpu.memory_space<vmem>>, vector<8x32xf32>,
    } else {
    }
    %c3_i32 = arith.constant 3 : i32
    %20 = arith.cmpi eq, %arg2, %c3_i32 : i32
    %21 = arith.extui %20 : i1 to i32
    %c0_i32_16 = arith.constant 0 : i32
    %22 = arith.cmpi ne, %21, %c0_i32_16 : i32
    scf.if %22 {
      %c0_17 = arith.constant 0 : index
      %c0_18 = arith.constant 0 : index
      %23 = vector.load %arg9[%c0_17, %c0_18] : memref<8x32xf32, #tpu.memory_space<vmem>>, vector<8x32xf32>
      %c0_19 = arith.constant 0 : index
      %c0_20 = arith.constant 0 : index
      %24 = vector.load %arg7[%c0_19, %c0_20] : memref<1x32xf32, #tpu.memory_space<vmem>>, vector<1x32xf32>
      %25 = vector.broadcast %24 : vector<1x32xf32> to vector<8x32xf32>
      %26 = arith.addf %23, %25 : vector<8x32xf32>
      %c0_21 = arith.constant 0 : index
      %c0_22 = arith.constant 0 : index
      %c0_23 = arith.constant 0 : index
      %27 = vector.load %arg8[%c0_21, %c0_22, %c0_23] : memref<1x8x32xf32, #tpu.memory_space<vmem>>, vector<1x8x32xf32>
      %28 = vector.shape_cast %27 : vector<1x8x32xf32> to vector<8x32xf32>
      %29 = vector.shape_cast %26 : vector<8x32xf32> to vector<1x8x32xf32>
      tpu.vector_store %arg8[%c0_21, %c0_22, %c0_23], %29 {strides = array<i32>} : memref<1x8x32xf32, #tpu.memory_space<vmem>>, vector<1x8x32xf32>,
    } else {
    }
    return
  }
  func.func @transform_0(%arg0: i32, %arg1: i32, %arg2: i32) -> (i32, i32, i32, i32) {
    %c0_i32 = arith.constant 0 : i32
    %c0_i32_0 = arith.constant 0 : i32
    return %arg0, %arg2, %arg1, %c0_i32 : i32, i32, i32, i32
  }
  func.func @transform_1(%arg0: i32, %arg1: i32, %arg2: i32) -> (i32, i32, i32, i32) {
    %c0_i32 = arith.constant 0 : i32
    %c0_i32_0 = arith.constant 0 : i32
    %c0_i32_1 = arith.constant 0 : i32
    %c0_i32_2 = arith.constant 0 : i32
    return %arg0, %c0_i32, %c0_i32_0, %c0_i32_1 : i32, i32, i32, i32
  }
  func.func @transform_2(%arg0: i32, %arg1: i32, %arg2: i32) -> (i32, i32, i32, i32) {
    %c0_i32 = arith.constant 0 : i32
    %c0_i32_0 = arith.constant 0 : i32
    %c0_i32_1 = arith.constant 0 : i32
    %c0_i32_2 = arith.constant 0 : i32
    return %arg0, %c0_i32, %c0_i32_0, %c0_i32_1 : i32, i32, i32, i32
  }
  func.func @transform_3(%arg0: i32, %arg1: i32, %arg2: i32) -> (i32, i32, i32) {
    %c0_i32 = arith.constant 0 : i32
    %c0_i32_0 = arith.constant 0 : i32
    %c0_i32_1 = arith.constant 0 : i32
    %c0_i32_2 = arith.constant 0 : i32
    return %c0_i32, %c0_i32_0, %c0_i32_1 : i32, i32, i32
  }
  func.func @transform_4(%arg0: i32, %arg1: i32, %arg2: i32) -> (i32, i32) {
    %c0_i32 = arith.constant 0 : i32
    %c0_i32_0 = arith.constant 0 : i32
    %c0_i32_1 = arith.constant 0 : i32
    return %c0_i32, %c0_i32_0 : i32, i32
  }
  func.func @transform_5(%arg0: i32, %arg1: i32, %arg2: i32) -> (i32, i32, i32) {
    %c0_i32 = arith.constant 0 : i32
    %c0_i32_0 = arith.constant 0 : i32
    return %arg0, %arg1, %c0_i32 : i32, i32, i32
  }
}

</mosaic_0001>

<bundles_post_ra>
// kernel: tpu_custom_call.1
= control target key start
LH: loop header
LB: loop body
LE: loop exit
PB: predicated region body
PF: predicated region fallthrough
CT: control target
= control target key end

     0   :  { %s1642_s0 = inlined_call_operand.hbm [shape: f32[2,4,8,8], index: 0, kind: input, shape index: {}]   ;;  %s1643_s1 = inlined_call_operand.hbm [shape: f32[2,4,8,8], index: 1, kind: input, shape index: {}]   ;;  %s1644_s2 = inlined_call_operand.hbm [shape: f32[2,4,8,8], index: 2, kind: input, shape index: {}]   ;;  %s1645_s3 = inlined_call_operand.hbm [shape: f32[4,8,32], index: 3, kind: input, shape index: {}]   ;;  %s1646_s4 = inlined_call_operand.vmem [shape: f32[1,32], index: 4, kind: input, shape index: {}]   ;;  %s1647_s5 = inlined_call_operand.hbm [shape: f32[2,8,32], index: 5, kind: output, shape index: {}]  }
   0x1   :  { %1676 = sst [smem:[#allocation27_spill]] %s1643_s1 }
   0x2   :  { %1677 = sst [smem:[#allocation28_spill]] %s1645_s3 }
   0x3   :  { %1678 = sst [smem:[#allocation29_spill]] %s1646_s4 }
   0x4   :  { %1679 = sst [smem:[#allocation30_spill]] %s1647_s5 }
   0x5   :  { %10 = vsyncpa [#allocation4], 0 }
   0x6   :  { %12 = vsyncpa [#allocation4 + $0x1], 0 }
   0x7   :  { %13 = vsyncpa [#allocation7], 0 }
   0x8   :  { %15 = vsyncpa [#allocation7 + $0x1], 0 }
   0x9   :  { %16 = vsyncpa [#allocation10], 0 }
   0xa   :  { %17 = vsyncpa [#allocation5], 0 }
   0xb   :  { %19 = vsyncpa [#allocation5 + $0x1], 0  ;;  %s1254_s18 = smov 0   ;;  %s1256_s19 = smov 0  }
   0xc   :  { %s1258_s20 = smov 0   ;;  %s1260_s21 = smov 0  }
   0xd   :  { %s1262_s22 = smov 0   ;;  %s1264_s23 = smov 0  }
   0xe   :  { %s1266_s24 = smov 0   ;;  %s1268_s25 = smov 0  }
   0xf   :  { %s1270_s26 = smov 0   ;;  %s1272_s27 = smov 0  }
  0x10   :  { %s1274_s28 = smov 0  }
  0x11 LB: > { %1680 = sst [smem:[#allocation16_spill]] %s1173_s18  ;;  %p1649_p0 = scmp.eq.s32.totalorder %s1213_s28, 0  ;;  %s1213_s28 = sphi %s1274_s28, %s25_s28   ;;  %s1209_s27 = sphi %s1272_s27, %s1743_s27   ;;  %s1205_s26 = sphi %s1270_s26, %s1742_s26   ;;  %s1201_s25 = sphi %s1268_s25, %s1741_s25   ;;  %s1197_s24 = sphi %s1266_s24, %s1740_s24   ;;  %s1193_s23 = sphi %s1264_s23, %s1739_s23   ;;  %s1189_s22 = sphi %s1262_s22, %s1738_s22   ;;  %s1185_s21 = sphi %s1260_s21, %s1737_s21   ;;  %s1181_s20 = sphi %s1258_s20, %s1736_s20   ;;  %s1177_s19 = sphi %s1256_s19, %s1735_s19   ;;  %s1173_s18 = sphi %s1254_s18, %s1730_s18  }
  0x12   : > { %1681 = sst [smem:[#allocation17_spill]] %s1177_s19  ;;  %p88_p1 = scmp.ne.s32.totalorder %s1181_s20, %s1177_s19 }
  0x13   : > { %1682 = sst [smem:[#allocation18_spill]] %s1189_s22  ;;  %p1648_p3 = scmp.lt.s32.totalorder %s1213_s28, 8 }
  0x14   : > { %1683 = sst [smem:[#allocation19_spill]] %s1197_s24  ;;  %p90_p2 = por %p88_p1, %p1649_p0 }
  0x15   : > { %1684 = sst [smem:[#allocation20_spill]] %s1201_s25  ;;  %s251_s29 = sand.u32 1, %s1213_s28  }
  0x16   : > { %s253_s30 = sand.u32 1, %s1181_s20   ;;  %s815_s7 = sshll.u32 %s1209_s27, 9 }
  0x17   : > { %s1320_s6 = sshll.u32 %s253_s30, 5  ;;  %s1685_s1 = sld [smem:[#allocation27_spill]] }
  0x18   : > { %s255_s11 = scalar_lea.vmem [#allocation6], %s1320_s6  ;;  %p1333_p4 = pnand %p1648_p3, %p90_p2 }
  0x19   : > { %s262_s12 = sshll.u32 %s255_s11, 4  ;;  %s1339_s14 = scalar_lea.sflag [#allocation7], %s251_s29  ;;  %s1337_s12 = int_to_ptr.vmem [resolvable:$true] %s262_s12 }
  0x1a   : > { %s1686_s13 = scalar_select %p1333_p4, 1, 0 }
  0x1b   : > { %p1659_p6 = pneg %p1333_p4 }
  0x1d   : > { %s1328_s10 = scalar_lea.hbm %s1685_s1, %s815_s7  ;;  %s970_s30 = scalar_lea.hbm %s1685_s1, 1024 }
  0x1e   : > { %s965_s15 = scalar_lea.hbm %s1328_s10, 512  ;;  %p971_p9 = scmp.lt.u32.totalorder %s1328_s10, %s1685_s1 }
  0x1f   : > { %p966_p5 = scmp.ne.s32.totalorder %s1328_s10, %s965_s15  ;;  %p972_p10 = scmp.lt.u32.totalorder %s970_s30, %s965_s15 }
  0x20   : > { %p974_p12 = scmp.lt.u32.totalorder %s965_s15, %s1328_s10 }
  0x21   : > { %p968_p7 = pnand %p1659_p6, %p966_p5  ;;  %p973_p11 = por %p972_p10, %p971_p9 }
  0x23   : > { %p969_p8 = pneg %p968_p7  ;;  %p975_p13 = por %p974_p12, %p973_p11 }
  0x25   : > { %p976_p2 = pnand %p975_p13, %p969_p8 }
  0x27   : > { %979 = shalt.err (!%p976_p2)
}
  0x28   : > { %s980_s29 = scalar_lea.vmem %s1337_s12, 512  ;;  %s1215_s11 = smov [#allocation6]  }
  0x29   : > { %p981_p5 = scmp.ne.s32.totalorder %s1337_s12, %s980_s29  ;;  %s985_s16 = sshll.u32 %s1215_s11, 4  ;;  %s986_s16 = int_to_ptr.vmem [resolvable:$false] %s985_s16 }
  0x2a   : > { %s987_s17 = scalar_lea.vmem %s986_s16, 1024  ;;  %p988_p0 = scmp.lt.s32.totalorder %s1337_s12, %s986_s16 }
  0x2b   : > { %p983_p7 = pnand %p981_p5, %p1659_p6  ;;  %p989_p9 = scmp.lt.s32.totalorder %s987_s17, %s980_s29 }
  0x2d   : > { %p984_p3 = pneg %p983_p7  ;;  %p990_p10 = por %p989_p9, %p988_p0 }
  0x2f   : > { %p991_p11 = pnand %p990_p10, %p984_p3 }
  0x31   : > { %994 = shalt.err (!%p991_p11)
}
  0x32   : > { %s1650_s15 = smov 128   ;;  %s1652_s30 = smov 8  }
  0x33   : > { %860 = dma.hbm_to_vmem [thread:$0]  (!%p1333_p4), %s1328_s10, 512, %s1337_s12, %s1339_s14, %s1650_s15, %s1650_s15, %s1652_s30  }
  0x34   : > { %s1375_s29 = scalar_lea.hbm %s1644_s2, %s815_s7  ;;  %s276_s11 = scalar_lea.vmem [#allocation8], %s1320_s6 }
  0x35   : > { %s1378_s16 = sshll.u32 %s276_s11, 4  ;;  %s1381_s17 = sadd.s32 4294967295, %s1213_s28   ;;  %s1487_s16 = int_to_ptr.vmem [resolvable:$true] %s1378_s16 }
  0x36   : > { %1687 = sst [smem:[#allocation21_spill]] %s1381_s17  ;;  %s783_s1 = sadd.s32 4294967294, %s1213_s28  }
  0x37   : > { %p1660_p0 = scmp.eq.s32.totalorder %s1381_s17, 0  ;;  %p94_p3 = scmp.ne.s32.totalorder %s1177_s19, %s1173_s18 }
  0x38   : > { %p188_p8 = scmp.eq.s32.totalorder %s1381_s17, 7  ;;  %p194_p12 = scmp.eq.s32.totalorder %s783_s1, 7 }
  0x39   : > { %p1390_p13 = por %p94_p3, %p1660_p0  ;;  %p784_p2 = scmp.ge.s32.totalorder %s1213_s28, 1 }
  0x3a   : > { %p1398_p5 = por %p188_p8, %p88_p1  ;;  %p1402_p7 = por %p194_p12, %p94_p3 }
  0x3b   : > { %s1688_s10 = scalar_select %p1390_p13, 1, 0 }
  0x3c   : > { %s1690_s6 = scalar_select %p1398_p5, 1, 0 }
  0x3d   : > { %1689 = sst [smem:[#allocation22_spill]] %s1688_s10  ;;  %p201_p9 = scmp.lt.s32.totalorder %s1213_s28, 9 }
  0x3e   : > { %1691 = sst [smem:[#allocation23_spill]] %s1690_s6  ;;  %s1218_s1 = smov [#allocation9]  }
  0x3f   : > { %s1692_s7 = scalar_select %p1402_p7, 1, 0 }
  0x40   : > { %p1407_p10 = pnand %p784_p2, %p201_p9  ;;  %s213_s8 = sshll.u32 %s1218_s1, 4  ;;  %s214_s8 = int_to_ptr.vmem [resolvable:$true] %s213_s8 }
  0x41   : > { %1693 = sst [smem:[#allocation24_spill]] %s1692_s7  ;;  %s37_s11 = sadd.s32 1, %s1205_s26 }
  0x42   : > { %s1694_s12 = scalar_select %p1407_p10, 1, 0 }
  0x43   : > { %p850_p11 = pneg %p1407_p10  ;;  %s1696_s3 = sld [smem:[#allocation28_spill]] }
  0x45   : > { %p1415_p1 = pnand %p850_p11, %p1660_p0 }
  0x47   : > { %p997_p8 = pneg %p1415_p1 }
  0x49   : > { %s995_s7 = scalar_lea.hbm %s1696_s3, 512 }
  0x4a   : > { %p996_p3 = scmp.ne.s32.totalorder %s1696_s3, %s995_s7  ;;  %p1002_p9 = scmp.lt.u32.totalorder %s995_s7, %s1696_s3 }
  0x4c   : > { %p998_p12 = pnand %p997_p8, %p996_p3 }
  0x4e   : > { %p999_p2 = pneg %p998_p12 }
  0x50   : > { %p1004_p11 = pnand %p1002_p9, %p999_p2 }
  0x52   : > { %1007 = shalt.err (!%p1004_p11)
}
  0x53   : > { %s1008_s25 = scalar_lea.vmem %s214_s8, 512  ;;  %p1016_p5 = scmp.lt.s32.totalorder %s214_s8, %s214_s8 }
  0x54   : > { %p1009_p6 = scmp.ne.s32.totalorder %s214_s8, %s1008_s25  ;;  %p1017_p13 = scmp.lt.s32.totalorder %s1008_s25, %s1008_s25 }
  0x56   : > { %p1011_p0 = pnand %p1009_p6, %p997_p8  ;;  %p1018_p10 = por %p1017_p13, %p1016_p5 }
  0x58   : > { %p1012_p7 = pneg %p1011_p0 }
  0x5a   : > { %p1019_p4 = pnand %p1018_p10, %p1012_p7 }
  0x5c   : > { %1022 = shalt.err (!%p1019_p4)
}
  0x5d   : > { %s1697_s5 = smov 8   ;;  %s1698_s18 = smov 128  }
  0x5e   : > { %853 = dma.hbm_to_vmem [thread:$0]  (!%p1415_p1), %s1696_s3, 512, %s214_s8, [#allocation10], %s1698_s18, %s1698_s18, %s1697_s5  }
  0x5f   : > { %p38_p4 = scmp.ge.s32.totalorder %s37_s11, 4  ;;  %s44_s25 = sadd.s32 1, %s1209_s27 }
  0x60   : > { %s55_s6 = sadd.s32 1, %s1193_s23  ;;  %p62_p6 = scmp.ne.s32.totalorder %s1193_s23, %s1189_s22 }
  0x61   : > { %s1745_s11 = smov (%p38_p4, %s37_s11), 0  ;;  %s1747_s25 = smov (!%p38_p4, %s44_s25), %s1209_s27 }
  0x62   : > { %1699 = sst [smem:[#allocation25_spill]] %s1745_s11  ;;  %s49_s7 = ssub.s32 %s1205_s26, %s1745_s11 }
  0x63   : > { %p1700_p0 = scmp.eq.s32.totalorder %s1213_s28, 0  ;;  %p46_p5 = scmp.ge.s32.totalorder %s1747_s25, 2 }
  0x64   : > { %p68_p7 = scmp.ne.s32.totalorder %s1189_s22, %s1185_s21  ;;  %s81_s8 = sadd.s32 1, %s1181_s20 }
  0x65   : > { %p1450_p13 = por %p1700_p0, %p62_p6  ;;  %s230_s1 = sand.u32 1, %s1193_s23  }
  0x66   : > { %s1749_s25 = smov (%p46_p5, %s1747_s25), 0  ;;  %p1702_p10 = scmp.eq.s32.totalorder %s1381_s17, 0 }
  0x67   : > { %s48_s30 = ssub.s32 %s1209_s27, %s1749_s25  ;;  %s787_s3 = sshll.u32 %s230_s1, 3 }
  0x68   : > { %p1462_p1 = por %p1702_p10, %p68_p7  ;;  %s50_s11 = sor.u32 %s49_s7, %s48_s30 }
  0x69   : > { %p79_p3 = scmp.eq.s32.totalorder %s48_s30, 0  ;;  %p53_p8 = scmp.eq.s32.totalorder %s50_s11, 0 }
  0x6a   : > { %s1703_s15 = scalar_select %p1462_p1, 1, 0 }
  0x6b   : > { %s1469_s4 = scalar_select %p79_p3, %s1181_s20, %s81_s8  }
  0x6c   : > { %1704 = sst [smem:[#allocation26_spill]] %s1703_s15  ;;  %s788_s24 = sshll.u32 %s1209_s27, 2 }
  0x6d   : > { %s1472_s21 = scalar_select %p53_p8, %s1193_s23, %s55_s6  }
  0x6e   : > { %s234_s10 = scalar_lea.vmem [#allocation3], %s787_s3  ;;  %s240_s22 = sadd.s32 %s1205_s26, %s788_s24 }
  0x6f   : > { %s244_s19 = sshll.u32 %s234_s10, 4  ;;  %s789_s17 = sshll.u32 %s240_s22, 7  ;;  %s1476_s19 = int_to_ptr.vmem [resolvable:$true] %s244_s19 }
  0x70   : > { %p1705_p12 = scmp.lt.s32.totalorder %s1213_s28, 8  ;;  %s1492_s7 = scalar_lea.hbm %s1642_s0, %s789_s17 }
  0x71   : > { %s231_s3 = scalar_lea.sflag [#allocation4], %s230_s1  ;;  %s1023_s22 = scalar_lea.hbm %s1492_s7, 128 }
  0x72   : > { %p1482_p2 = pnand %p1705_p12, %p1450_p13  ;;  %p1024_p9 = scmp.ne.s32.totalorder %s1492_s7, %s1023_s22 }
  0x73   : > { %s1028_s9 = scalar_lea.hbm %s1642_s0, 1024  ;;  %p1029_p0 = scmp.lt.u32.totalorder %s1492_s7, %s1642_s0 }
  0x74   : > { %p1025_p11 = pneg %p1482_p2  ;;  %p1030_p13 = scmp.lt.u32.totalorder %s1028_s9, %s1023_s22 }
  0x75   : > { %p1032_p7 = scmp.lt.u32.totalorder %s1023_s22, %s1492_s7 }
  0x76   : > { %p1026_p4 = pnand %p1025_p11, %p1024_p9  ;;  %p1031_p5 = por %p1030_p13, %p1029_p0 }
  0x78   : > { %p1027_p6 = pneg %p1026_p4  ;;  %p1033_p10 = por %p1032_p7, %p1031_p5 }
  0x7a   : > { %p1034_p3 = pnand %p1033_p10, %p1027_p6 }
  0x7c   : > { %1037 = shalt.err (!%p1034_p3)
}
  0x7d   : > { %s1038_s1 = scalar_lea.vmem %s1476_s19, 128  ;;  %s1219_s30 = smov [#allocation3]  }
  0x7e   : > { %p1039_p8 = scmp.ne.s32.totalorder %s1476_s19, %s1038_s1  ;;  %s1043_s11 = sshll.u32 %s1219_s30, 4  ;;  %s1044_s11 = int_to_ptr.vmem [resolvable:$false] %s1043_s11 }
  0x7f   : > { %s1045_s6 = scalar_lea.vmem %s1044_s11, 256  ;;  %p1046_p4 = scmp.lt.s32.totalorder %s1476_s19, %s1044_s11 }
  0x80   : > { %p1041_p12 = pnand %p1039_p8, %p1025_p11  ;;  %p1047_p0 = scmp.lt.s32.totalorder %s1045_s6, %s1038_s1 }
  0x82   : > { %p1042_p9 = pneg %p1041_p12  ;;  %p1048_p13 = por %p1047_p0, %p1046_p4 }
  0x84   : > { %p1049_p5 = pnand %p1048_p13, %p1042_p9 }
  0x86   : > { %1052 = shalt.err (!%p1049_p5)
}
  0x87   : > { %857 = dma.hbm_to_vmem [thread:$0]  (!%p1482_p2), %s1492_s7, 128, %s1476_s19, %s231_s3  }
  0x88   : > { %s1053_s22 = scalar_lea.hbm %s1375_s29, 512  ;;  %p1707_p6 = scmp.ne.s32.totalorder %s1686_s13, 0 }
  0x89   : > { %p1054_p11 = scmp.ne.s32.totalorder %s1375_s29, %s1053_s22  ;;  %s1058_s9 = scalar_lea.hbm %s1644_s2, 1024 }
  0x8a   : > { %p1708_p7 = pneg %p1707_p6  ;;  %p1059_p8 = scmp.lt.u32.totalorder %s1375_s29, %s1644_s2 }
  0x8b   : > { %p1060_p12 = scmp.lt.u32.totalorder %s1058_s9, %s1053_s22  ;;  %p1062_p4 = scmp.lt.u32.totalorder %s1053_s22, %s1375_s29 }
  0x8c   : > { %p1056_p10 = pnand %p1054_p11, %p1708_p7 }
  0x8d   : > { %p1061_p9 = por %p1060_p12, %p1059_p8 }
  0x8e   : > { %p1057_p3 = pneg %p1056_p10 }
  0x8f   : > { %p1063_p0 = por %p1062_p4, %p1061_p9 }
  0x91   : > { %p1064_p13 = pnand %p1063_p0, %p1057_p3 }
  0x93   : > { %1067 = shalt.err (!%p1064_p13)
}
  0x94   : > { %s1068_s19 = scalar_lea.vmem %s1487_s16, 512  ;;  %p1709_p5 = pmov %p1708_p7 }
  0x95   : > { %p1069_p2 = scmp.ne.s32.totalorder %s1487_s16, %s1068_s19  ;;  %s1220_s7 = smov [#allocation8]  }
  0x96   : > { %s1073_s3 = sshll.u32 %s1220_s7, 4  ;;  %s1074_s3 = int_to_ptr.vmem [resolvable:$false] %s1073_s3 }
  0x97   : > { %p1071_p11 = pnand %p1069_p2, %p1709_p5  ;;  %s1075_s17 = scalar_lea.vmem %s1074_s3, 1024 }
  0x98   : > { %p1076_p10 = scmp.lt.s32.totalorder %s1487_s16, %s1074_s3  ;;  %p1077_p8 = scmp.lt.s32.totalorder %s1075_s17, %s1068_s19 }
  0x99   : > { %p1072_p7 = pneg %p1071_p11 }
  0x9a   : > { %p1078_p12 = por %p1077_p8, %p1076_p10 }
  0x9c   : > { %p1079_p9 = pnand %p1078_p12, %p1072_p7 }
  0x9e   : > { %1082 = shalt.err (!%p1079_p9)
}
  0x9f   : > { %863 = dma.hbm_to_vmem [thread:$0]  (!%p1707_p6), %s1375_s29, 512, %s1487_s16, %s1339_s14, %s1698_s18, %s1698_s18, %s1697_s5  }
  0xa0   : > { %p1710_p3 = scmp.ne.s32.totalorder %s1694_s12, 0 }
  0xa1   : > { %s1711_s1 = sld [smem:[#allocation18_spill]] (!%p1710_p3) }
  0xa2   : > { %295 = sbr.rel (%p1710_p3) target bundleno = 893 (0x37d), region = 40 }
  0xa7   : > { %s297_s11 = sand.u32 (!%p1710_p3), 1, %s1711_s1  }
  0xa8   : > { %s797_s6 = sshll.u32 (!%p1710_p3), %s297_s11, 3  ;;  %s298_s22 = scalar_lea.sflag (!%p1710_p3), [#allocation4], %s297_s11 }
  0xa9   : > { %s301_s24 = scalar_lea.vmem [#allocation3], %s797_s6 }
  0xaa   : > { %1156 = dma.done.wait (%p1462_p1), %s298_s22, 128  }
  0xab   : > { %1158 = vsyncadd (%p1462_p1), %s298_s22, 4294967168  ;;  %s1713_s13 = sld [smem:[#allocation21_spill]]  ;;  %s1714_s10 = sld [smem:[#allocation17_spill]] }
  0xac   : > { %s1715_s9 = sld [smem:[#allocation22_spill]] }
  0xb1   : > { %s306_s8 = sand.u32 1, %s1713_s13   ;;  %s1555_s15 = sand.u32 1, %s1714_s10  }
  0xb2   : > { %s798_s14 = sshll.u32 %s1555_s15, 5  ;;  %s307_s29 = scalar_lea.sflag [#allocation7], %s306_s8 }
  0xb3   : > { %s310_s16 = scalar_lea.vmem [#allocation6], %s798_s14  ;;  %p1716_p6 = scmp.ne.s32.totalorder %s1715_s9, 0 }
  0xb5   : > { %1160 = dma.done.wait (%p1716_p6), %s307_s29, 1024  }
  0xb6   : > { %1162 = vsyncadd (%p1716_p6), %s307_s29, 4294966272  ;;  %s319_s12 = scalar_lea.vmem [#allocation8], %s798_s14  ;;  %p1717_p4 = scmp.eq.s32.totalorder %s1713_s13, 0 }
  0xb8   : > { %1164 = dma.done.wait (%p1717_p4), [#allocation10], 512   ;;  %p1718_p1 = pmov %p1717_p4 }
  0xb9   : > { %s1719_s5 = sld [smem:[#allocation19_spill]]  ;;  %s801_s18 = sshll.u32 %s1555_s15, 3  ;;  %v1221_v0 = vmov 0.0   ;;  %vm1222_vm0 = vmmov 0   ;;  %vm366_vm1 = vcmask 64512   ;;  %v360_v2 = vld [vmem:[%s301_s24] sm:$0xff] }
  0xba   : > { %1166 = vsyncadd (%p1718_p1), [#allocation10], 4294966784  ;;  %823 = vmatprep.subr.mxu0 %v1221_v0  ;;  %828 = vmatprep.subr.mxu1 %v1221_v0  ;;  %s359_s1 = scalar_lea.vmem [#allocation11], %s801_s18 }
  0xbb   : > { %825 = vmatprep.mubr.msk.f32.mxu0 %vm1222_vm0, %v1221_v0  ;;  %830 = vmatprep.mubr.msk.f32.mxu1 %vm1222_vm0, %v1221_v0 }
  0xbf   : > { %s802_s19 = sshll.u32 %s1719_s5, 3  ;;  %p807_p0 = scmp.ne.s32.totalorder %s1719_s5, 0 }
  0xc0   : > { %s362_s7 = scalar_lea.vmem %s310_s16, %s802_s19 [#allocation6]  ;;  %s364_s3 = scalar_lea.vmem %s319_s12, %s802_s19 [#allocation8]  ;;  %vm595_vm2 = vcmask (!%p807_p0), 261120  }
  0xc1   : > { %v363_v1 = vld [vmem:[%s362_s7] sm:$0xff]  ;;  %s516_s17 = scalar_lea.vmem [#allocation9], %s802_s19 }
  0xc2   : > { %824 = vmatpush3.xpose.msk.msra.mxu0 %vm366_vm1, %v363_v1  ;;  %v365_v3 = vld [vmem:[%s364_s3] sm:$0xff] }
  0xc3   : > { %829 = vmatpush3.msra.mxu1 %v365_v3  ;;  %v517_v4 = vld [vmem:[%s516_s17] sm:$0xff] }
  0xc4   : > { %833 = vmatprep.subr.mxu1 %v1221_v0 }
  0xc5   : > { %826 = vmatmul.mubr.msk.f32.vlgmr.msra.gmra.mrb[0].mxu0 %vm366_vm1, %v360_v2 }
 0x198   : > { %v439_v5 = vpop.f32.mrb[0].mxu0 }
 0x199   : > { %v827_v6 = vpop.f32.mrb[1].mxu0  ;;  %831 = vmatmul.mubr.msk.f32.vlgmr.msra.gmra.mrb[0].mxu1 %vm366_vm1, %v439_v5 }
 0x19a   : > { %834 = vmatpush3.msra.mxu1 %v517_v4  ;;  %835 = vmatprep.mubr.msk.f32.mxu1 %vm1222_vm0, %v1221_v0 }
 0x26c   : > { %v512_v7 = vpop.f32.mrb[0].mxu1 }
 0x26d   : > { %v832_v8 = vpop.f32.mrb[1].mxu1  ;;  %836 = vmatmul.mubr.msk.f32.vlgmr.msra.gmra.mrb[2].mxu1 %vm366_vm1, %v512_v7 }
 0x33b   : > { %594 = sbr.rel (%p807_p0) target bundleno = 834 (0x342), region = 60 }
 0x340   : > { %v587_v9 = vpop.f32.mrb[2].mxu1 }
 0x341   : > { %v837_v10 = vpop.f32.mrb[3].mxu1  ;;  %596 = vst.msk [vmem:[#allocation2] sm:$0xff] (!%p807_p0), %vm595_vm2, %v587_v9 }
 0x342 PF: > { %s1720_s30 = sld [smem:[#allocation19_spill]] }
 0x348   : > { %p808_p13 = scmp.eq.s32.totalorder %s1720_s30, 0 }
 0x349   : > { %v601_v11 = vld [vmem:[#allocation2] sm:$0xff] (!%p808_p13)  ;;  %vm603_vm3 = vcmask (!%p808_p13), 261120  }
 0x34a   : > { %600 = sbr.rel (%p808_p13) target bundleno = 849 (0x351), region = 64  ;;  %v602_v12 = vadd.f32 (!%p808_p13), %v601_v11, %v587_v9 }
 0x34c   : > { %604 = vst.msk [vmem:[#allocation2] sm:$0xff] (!%p808_p13), %vm603_vm3, %v602_v12 }
 0x351 PF: > { %s1721_s11 = sld [smem:[#allocation19_spill]] }
 0x357   : > { %p809_p2 = scmp.ne.s32.totalorder %s1721_s11, 3 }
 0x358   : > { %v609_v13 = vld [vmem:[#allocation2] sm:$0xff] (!%p809_p2)  ;;  %s1722_s24 = sld [smem:[#allocation29_spill]] (!%p809_p2)  ;;  %vm618_vm4 = vcmask (!%p809_p2), 261120  }
 0x359   : > { %608 = sbr.rel (%p809_p2) target bundleno = 866 (0x362), region = 68 }
 0x35e   : > { %v810_v14 = vld [vmem:[%s1722_s24] ss:$0 sm:$0xff] (!%p809_p2) }
 0x35f   : > { %v617_v15 = vadd.f32 (!%p809_p2), %v810_v14, %v609_v13 }
 0x361   : > { %619 = vst.msk [vmem:[%s359_s1] sm:$0xff] %vm618_vm4, %v617_v15 }
 0x362 PF: > { %s1723_s13 = sld [smem:[#allocation20_spill]]  ;;  %s1724_s10 = sld [smem:[#allocation23_spill]] }
 0x363   : > { %s1725_s29 = sld [smem:[#allocation30_spill]]  ;;  %s635_s12 = sshll.u32 %s359_s1, 4  ;;  %s636_s12 = int_to_ptr.vmem [resolvable:$true] %s635_s12 }
 0x364   : > { %s621_s5 = scalar_lea.sflag [#allocation5], %s1555_s15  ;;  %s1083_s18 = scalar_lea.vmem %s636_s12, 128 }
 0x365   : > { %p1084_p5 = scmp.ne.s32.totalorder %s636_s12, %s1083_s18  ;;  %s1223_s19 = smov [#allocation11]  }
 0x366   : > { %s1087_s7 = sshll.u32 %s1223_s19, 4  ;;  %s1088_s7 = int_to_ptr.vmem [resolvable:$false] %s1087_s7 }
 0x367   : > { %s1089_s3 = scalar_lea.vmem %s1088_s7, 256  ;;  %p1090_p8 = scmp.lt.s32.totalorder %s636_s12, %s1088_s7 }
 0x368   : > { %s812_s9 = sshll.u32 %s1723_s13, 7  ;;  %p1726_p11 = scmp.ne.s32.totalorder %s1724_s10, 0 }
 0x369   : > { %s1585_s16 = scalar_lea.hbm %s1725_s29, %s812_s9  ;;  %p1091_p12 = scmp.lt.s32.totalorder %s1089_s3, %s1083_s18 }
 0x36a   : > { %p1085_p7 = pnand %p1084_p5, %p1726_p11 }
 0x36b   : > { %p1092_p9 = por %p1091_p12, %p1090_p8 }
 0x36c   : > { %p1086_p10 = pneg %p1085_p7 }
 0x36e   : > { %p1093_p3 = pnand %p1092_p9, %p1086_p10 }
 0x370   : > { %1096 = shalt.err (!%p1093_p3)
}
 0x371   : > { %s1097_s15 = scalar_lea.hbm %s1585_s16, 128  ;;  %s1101_s30 = scalar_lea.hbm %s1725_s29, 256 }
 0x372   : > { %p1098_p6 = scmp.ne.s32.totalorder %s1585_s16, %s1097_s15  ;;  %p1102_p0 = scmp.lt.u32.totalorder %s1585_s16, %s1725_s29 }
 0x373   : > { %p1103_p13 = scmp.lt.u32.totalorder %s1101_s30, %s1097_s15  ;;  %p1105_p5 = scmp.lt.u32.totalorder %s1097_s15, %s1585_s16 }
 0x374   : > { %p1099_p4 = pnand %p1098_p6, %p1726_p11 }
 0x375   : > { %p1104_p2 = por %p1103_p13, %p1102_p0 }
 0x376   : > { %p1100_p1 = pneg %p1099_p4 }
 0x377   : > { %p1106_p7 = por %p1105_p5, %p1104_p2 }
 0x379   : > { %p1107_p10 = pnand %p1106_p7, %p1100_p1 }
 0x37b   : > { %1110 = shalt.err (!%p1107_p10)
}
 0x37c   : > { %848 = dma.vmem_to_hbm [thread:$0]  (%p1726_p11), %s636_s12, 128, %s1585_s16, %s621_s5  }
 0x37d PF: > { %s1727_s22 = sld [smem:[#allocation16_spill]]  ;;  %s1728_s24 = sld [smem:[#allocation24_spill]] }
 0x37e   : > { %p871_p8 = scmp.ge.s32.totalorder %s1213_s28, 2 }
 0x383   : > { %s647_s13 = sand.u32 1, %s1727_s22   ;;  %p1729_p12 = scmp.ne.s32.totalorder %s1728_s24, 0 }
 0x384   : > { %s648_s9 = scalar_lea.sflag [#allocation5], %s647_s13 }
 0x385   : > { %p865_p9 = pnand %p871_p8, %p1729_p12 }
 0x387   : > { %1168 = dma.done.wait (!%p865_p9), %s648_s9, 128  }
 0x388   : > { %1170 = vsyncadd (!%p865_p9), %s648_s9, 4294967168  ;;  %s25_s28 = sadd.s32 1, %s1213_s28   ;;  %s1730_s18 = sld [smem:[#allocation17_spill]] }
 0x389   : > { %p22_p3 = scmp.ge.s32.totalorder %s25_s28, 10   ;;  %s1731_s10 = sld [smem:[#allocation18_spill]] }
 0x38a   : > { %s1732_s8 = smov %s1472_s21  ;;  %s1733_s14 = sld [smem:[#allocation25_spill]] }
 0x38b   : > { %s1734_s16 = smov %s1749_s25  ;;  %s1735_s19 = smov %s1181_s20 }
 0x38c   : > { %s1736_s20 = smov %s1469_s4  ;;  %s1738_s22 = smov %s1193_s23 }
 0x38d   : > { %s1739_s23 = smov %s1732_s8  ;;  %s1740_s24 = smov %s1205_s26 }
 0x38e   : > { %s1741_s25 = smov %s1209_s27  ;;  %s1743_s27 = smov %s1734_s16 }
 0x38f   : > { %s1737_s21 = smov %s1731_s10  ;;  %24 = sbr.rel (!%p22_p3) target bundleno = 17 (0x11), region = 128 }
 0x390   : > { %s1742_s26 = smov %s1733_s14 }
 0x396   :  { %653 = vsyncpa [#allocation4], 1 }
 0x397   :  { %655 = vsyncpa [#allocation4 + $0x1], 1 }
 0x398   :  { %656 = vsyncpa [#allocation7], 1 }
 0x399   :  { %658 = vsyncpa [#allocation7 + $0x1], 1 }
 0x39a   :  { %659 = vsyncpa [#allocation10], 1 }
 0x39b   :  { %660 = vsyncpa [#allocation5], 1 }
 0x39c   :  { %662 = vsyncpa [#allocation5 + $0x1], 1 }

</bundles_post_ra>
